<compile_context>
chip_gen: v5e
topology: v5e:2x2
jax: 0.10.0
libtpu: 0.0.40
codegen_flags: <defaults>
</compile_context>

<pallas_src>
import jax
import jax.numpy as jnp
from jax import lax
from jax.experimental import pallas as pl
from jax.experimental.pallas import tpu as pltpu


def _round_up(x, m):
    return ((x + m - 1) // m) * m


def _span_probe_kernel(x_ref, bounds_ref, watt_ref, batt_ref, wcls_ref, bcls_ref,
                       out_ref, att_ref, emb_ref):
    """One grid step == `bb` batch elements.

    x_ref      : VMEM [bb, T, D]         token embeddings (native dtype)
    bounds_ref : VMEM int32 [bb, S_pad, 2]  inclusive (start, end), end pre-clamped
                 to start + max_width - 1; padding rows are (0, -1)
    watt_ref   : VMEM [D, 1]             attention Linear weight^T (compute dtype)
    batt_ref   : VMEM f32 [1, 1]         attention Linear bias
    wcls_ref   : VMEM [D, L_pad]         classifier weight^T (compute dtype, zero-padded)
    bcls_ref   : VMEM f32 [1, L_pad]     classifier bias (zero-padded)
    out_ref    : VMEM f32 [bb, S_pad, L_pad]
    att_ref    : VMEM f32 [bb, T, 1]     scratch: per-token attention logits
    emb_ref    : VMEM f32 [bb, S_pad, D] scratch: span embeddings for batched classifier
    """
    bb, T, D = x_ref.shape
    s_pad = bounds_ref.shape[1]
    l_pad = out_ref.shape[2]

    # --- 1. Block-wide attention projection: one MXU issue for all bb*T tokens.
    watt = watt_ref[...]                                                 # [D, 1]
    b_att = batt_ref[...]                                                # [1, 1] f32
    x2d = x_ref[...].reshape(bb * T, D)                                  # leading-dim merge
    att = jnp.dot(x2d, watt, preferred_element_type=jnp.float32) + b_att  # [bb*T, 1] f32
    att_ref[...] = att.reshape(bb, T, 1)

    # Loop-invariant position table, hoisted out of the batch loop
    # (JAX does not CSE broadcast/iota inside loops).
    pos = lax.broadcasted_iota(jnp.int32, (s_pad, T), 1)

    # --- 2. Per batch element: masked softmax (exp once per token) + span sums.
    def body(bi, carry):
        x = x_ref[bi]                                                    # [T, D]
        att_row = att_ref[bi].reshape(1, T)                              # small relayout
        # softmax is shift invariant -> a single global max suffices; exp is
        # computed once per token (T transcendentals), shared by every span.
        e_row = jnp.exp(att_row - jnp.max(att_row))                      # [1, T] f32

        b = bounds_ref[bi]                                               # [S_pad, 2] int32
        starts = b[:, 0:1]                                               # [S_pad, 1]
        ends = b[:, 1:2]                                                 # [S_pad, 1] (pre-clamped)
        valid = (pos >= starts) & (pos <= ends)                          # [S_pad, T]

        p = valid.astype(jnp.float32) * e_row                            # [S_pad, T]
        denom = jnp.sum(p, axis=1, keepdims=True) + 1e-13                # [S_pad, 1]
        inv = 1.0 / denom                                                # exact reciprocal

        # Un-normalized weighted span sums on the MXU, normalized AFTER the
        # matmul ([S_pad, D] multiply instead of an [S_pad, T] divide).
        emb = jnp.dot(p.astype(x.dtype), x, preferred_element_type=jnp.float32)
        emb_ref[bi] = emb * inv                                          # [S_pad, D] f32
        return carry

    lax.fori_loop(0, bb, body, 0)

    # --- 3. Batched classifier: one [bb*S_pad, D] @ [D, L_pad] matmul, lane-dense store.
    wcls = wcls_ref[...]                                                 # [D, L_pad]
    bcls = bcls_ref[...]                                                 # [1, L_pad] f32
    emb_all = emb_ref[...].reshape(bb * s_pad, D)
    logits = jnp.dot(emb_all.astype(wcls.dtype), wcls,
                     preferred_element_type=jnp.float32) + bcls
    out_ref[...] = logits.reshape(bb, s_pad, l_pad).astype(out_ref.dtype)


def _has_multiple_tensorcores():
    """v7x exposes two TensorCores per chip (megacore); v5e/v6e have one."""
    try:
        kind = jax.devices()[0].device_kind.lower()
        return "v7" in kind
    except Exception:
        return True       # unknown -> conservatively keep both cores busy


def _vmem_block_bytes(bb, T, D, s_pad, l_pad, in_itemsize):
    """Per-step VMEM estimate covering ALL buffers: double-buffered pipeline
    blocks (input, bounds, output, weights), one extra x-block copy for the
    in-kernel 2-D reshape, and the f32 scratches (att scratch lane-padded)."""
    x_blk = bb * T * D * in_itemsize
    bounds_blk = bb * s_pad * 2 * 4
    out_blk = bb * s_pad * l_pad * 4
    weight_blk = (D + D * l_pad) * in_itemsize + (1 + l_pad) * 4
    scratch = bb * T * 128 * 4 + bb * s_pad * D * 4
    return 3 * x_blk + 2 * (bounds_blk + out_blk + weight_blk) + scratch


def _pick_batch_block(B, T, D, s_pad, l_pad, in_itemsize, budget_bytes=20 << 20):
    """Largest bb dividing B whose full VMEM footprint stays under budget.
    Only on multi-TensorCore chips (v7x) do we keep the grid >= 2 so both
    cores get work under dimension_semantics=('parallel',)."""
    need_two_steps = _has_multiple_tensorcores() and B >= 2
    bb = 1
    for cand in range(1, B + 1):
        if B % cand:
            continue
        if need_two_steps and B // cand < 2:
            break
        if _vmem_block_bytes(cand, T, D, s_pad, l_pad, in_itemsize) > budget_bytes:
            break
        bb = cand
    return bb


def span_probe_forward(unpooled, spans, w_att, b_att, w_cls, b_cls, *,
                       max_width, batch_block=None):
    """Pallas SpanProbe forward. Returns logits of shape [B*S, num_labels] (f32)."""
    B, T, D = unpooled.shape
    S = spans.shape[1]
    L = w_cls.shape[0]
    assert max_width >= 1

    s_pad = _round_up(max(S, 1), 8)       # sublane-aligned span rows
    l_pad = _round_up(max(L, 1), 128)     # lane-dense label columns

    compute_dtype = unpooled.dtype        # stream input/weights at native dtype
    itemsize = jnp.dtype(compute_dtype).itemsize

    bb = (_pick_batch_block(B, T, D, s_pad, l_pad, itemsize)
          if batch_block is None else batch_block)
    assert B % bb == 0, "batch_block must divide the batch size"

    # Span bounds table; width truncation is pre-applied on the host so the
    # kernel mask is just (pos >= start) & (pos <= end). Padding rows (0, -1).
    spans_i = spans.astype(jnp.int32)
    starts = spans_i[..., 0]
    ends = jnp.minimum(spans_i[..., 1], starts + (max_width - 1))
    bounds = jnp.full((B, s_pad, 2), -1, dtype=jnp.int32)
    bounds = bounds.at[:, :, 0].set(0)
    bounds = bounds.at[:, :S, 0].set(starts)
    bounds = bounds.at[:, :S, 1].set(ends)

    w_att_t = jnp.transpose(w_att).astype(compute_dtype)                   # [D, 1]
    b_att_2d = b_att.reshape(1, 1).astype(jnp.float32)                     # [1, 1]
    w_cls_t = jnp.zeros((D, l_pad), compute_dtype).at[:, :L].set(
        jnp.transpose(w_cls).astype(compute_dtype))                        # [D, L_pad]
    b_cls_2d = jnp.zeros((1, l_pad), jnp.float32).at[:, :L].set(
        b_cls.reshape(1, L).astype(jnp.float32))                           # [1, L_pad]

    est_bytes = _vmem_block_bytes(bb, T, D, s_pad, l_pad, itemsize)
    vmem_limit = (32 << 20) if est_bytes > (12 << 20) else None            # safe on v5e/v6e/v7x

    out = pl.pallas_call(
        _span_probe_kernel,
        out_shape=jax.ShapeDtypeStruct((B, s_pad, l_pad), jnp.float32),
        grid_spec=pltpu.PrefetchScalarGridSpec(
            num_scalar_prefetch=0,
            grid=(B // bb,),
            in_specs=[
                pl.BlockSpec((bb, T, D), lambda g: (g, 0, 0)),       # unpooled (native dtype)
                pl.BlockSpec((bb, s_pad, 2), lambda g: (g, 0, 0)),   # span bounds
                pl.BlockSpec((D, 1), lambda g: (0, 0)),              # w_att^T
                pl.BlockSpec((1, 1), lambda g: (0, 0)),              # b_att
                pl.BlockSpec((D, l_pad), lambda g: (0, 0)),          # w_cls^T (padded)
                pl.BlockSpec((1, l_pad), lambda g: (0, 0)),          # b_cls (padded)
            ],
            out_specs=pl.BlockSpec((bb, s_pad, l_pad), lambda g: (g, 0, 0)),
            scratch_shapes=[
                pltpu.VMEM((bb, T, 1), jnp.float32),        # attention logits
                pltpu.VMEM((bb, s_pad, D), jnp.float32),    # span embeddings
            ],
        ),
        compiler_params=pltpu.CompilerParams(
            dimension_semantics=("parallel",),
            vmem_limit_bytes=vmem_limit,
        ),
    )(unpooled, bounds, w_att_t, b_att_2d, w_cls_t, b_cls_2d)

    return out[:, :S, :L].reshape(B * S, L)


def span_probe_reference(unpooled, spans, w_att, b_att, w_cls, b_cls, max_width):
    """Pure-JAX reference mirroring AllenNLP SelfAttentiveSpanExtractor + Linear."""
    B, T, D = unpooled.shape
    att = jnp.einsum("btd,od->bt", unpooled, w_att) + b_att[0]      # [B, T]
    starts, ends = spans[..., 0], spans[..., 1]
    j = jnp.arange(max_width)
    raw = starts[..., None] + j[None, None, :]                      # [B, S, W]
    mask = (j[None, None, :] <= (ends - starts)[..., None]) & (raw < T) & (raw >= 0)
    idx = jnp.where(mask, raw, 0)
    gathered = jax.vmap(lambda xb, ib: xb[ib])(unpooled, idx)       # [B, S, W, D]
    att_g = jax.vmap(lambda ab, ib: ab[ib])(att, idx)               # [B, S, W]
    att_g = jnp.where(mask, att_g, -1e30)
    att_g = att_g - att_g.max(-1, keepdims=True)
    p = jnp.exp(att_g) * mask.astype(jnp.float32)
    wts = p / (p.sum(-1, keepdims=True) + 1e-13)
    span_emb = (wts[..., None] * gathered).sum(axis=2)              # [B, S, D]
    flat = span_emb.reshape(-1, D)
    return flat @ w_cls.T + b_cls


if __name__ == "__main__":
    B, T, D = 2, 16, 32          # batch, seq, hidden
    S, W, L = 4, 8, 4            # spans per example, max span width, num_labels

    key = jax.random.PRNGKey(0)
    k_x, k_s1, k_s2, k_wa, k_ba, k_wc, k_bc = jax.random.split(key, 7)

    unpooled = jax.random.normal(k_x, (B, T, D), dtype=jnp.float32)

    starts = jax.random.randint(k_s1, (B, S), 0, T)
    widths = jax.random.randint(k_s2, (B, S), 0, W)
    ends = jnp.minimum(starts + widths, T - 1)
    spans = jnp.stack([starts, ends], axis=-1).astype(jnp.int32)    # [B, S, 2]

    # Deterministic parameter init (shapes from SpanProbe.__init__ / AllenNLP).
    w_att = 0.05 * jax.random.normal(k_wa, (1, D), dtype=jnp.float32)   # Linear(D, 1).weight
    b_att = 0.05 * jax.random.normal(k_ba, (1,), dtype=jnp.float32)     # Linear(D, 1).bias
    w_cls = 0.05 * jax.random.normal(k_wc, (L, D), dtype=jnp.float32)   # Linear(D, L).weight
    b_cls = 0.05 * jax.random.normal(k_bc, (L,), dtype=jnp.float32)     # Linear(D, L).bias

    ref = span_probe_reference(unpooled, spans, w_att, b_att, w_cls, b_cls, W)

    # f32 path: default batch block and an explicit bb=2 block (exercises the
    # multi-element-per-step path, the fori_loop, and the batched classifier).
    for bb in (None, 2):
        logits = span_probe_forward(unpooled, spans, w_att, b_att, w_cls, b_cls,
                                    max_width=W, batch_block=bb)
        logits = jax.block_until_ready(logits)
        assert logits.shape == (B * S, L)
        assert jnp.allclose(logits, ref, atol=1e-4, rtol=1e-4), (
            f"bb={bb}: max abs err {jnp.max(jnp.abs(logits - ref))}")

    # bf16 streaming path (halves HBM traffic; f32 accumulation) — looser tolerance.
    logits_bf16 = span_probe_forward(unpooled.astype(jnp.bfloat16), spans,
                                     w_att, b_att, w_cls, b_cls, max_width=W)
    logits_bf16 = jax.block_until_ready(logits_bf16)
    assert logits_bf16.shape == (B * S, L)
    assert jnp.allclose(logits_bf16, ref, atol=3e-2, rtol=3e-2), (
        f"bf16: max abs err {jnp.max(jnp.abs(logits_bf16 - ref))}")

    print("KERNEL_OK")
</pallas_src>

<mosaic_0001>
module attributes {stable_mosaic.version = 11 : i64} {
  func.func @_span_probe_kernel(%arg0: i32, %arg1: memref<2x16x32xf32, #tpu.memory_space<vmem>>, %arg2: memref<2x8x2xi32, #tpu.memory_space<vmem>>, %arg3: memref<32x1xf32, #tpu.memory_space<vmem>>, %arg4: memref<1x1xf32, #tpu.memory_space<vmem>>, %arg5: memref<32x128xf32, #tpu.memory_space<vmem>>, %arg6: memref<1x128xf32, #tpu.memory_space<vmem>>, %arg7: memref<2x8x128xf32, #tpu.memory_space<vmem>>, %arg8: memref<2x16x1xf32, #tpu.memory_space<vmem>>, %arg9: memref<2x8x32xf32, #tpu.memory_space<vmem>>) attributes {dimension_semantics = [#tpu.dimension_semantics<parallel>], iteration_bounds = array<i64: 1>, scalar_prefetch = 0 : i64, scratch_operands = 2 : i64, tpu.core_type = #tpu.core_type<tc>, window_params = [{transform_indices = @transform_0, window_bounds = array<i64: 2, 16, 32>}, {transform_indices = @transform_1, window_bounds = array<i64: 2, 8, 2>}, {pipeline_mode = #tpu.pipeline_mode<synchronous>, transform_indices = @transform_2, window_bounds = array<i64: 32, 1>}, {pipeline_mode = #tpu.pipeline_mode<synchronous>, transform_indices = @transform_3, window_bounds = array<i64: 1, 1>}, {pipeline_mode = #tpu.pipeline_mode<synchronous>, transform_indices = @transform_4, window_bounds = array<i64: 32, 128>}, {pipeline_mode = #tpu.pipeline_mode<synchronous>, transform_indices = @transform_5, window_bounds = array<i64: 1, 128>}, {transform_indices = @transform_6, window_bounds = array<i64: 2, 8, 128>}]} {
    %c0 = arith.constant 0 : index
    %c0_0 = arith.constant 0 : index
    %0 = vector.load %arg3[%c0, %c0_0] : memref<32x1xf32, #tpu.memory_space<vmem>>, vector<32x1xf32>
    %c0_1 = arith.constant 0 : index
    %c0_2 = arith.constant 0 : index
    %1 = vector.load %arg4[%c0_1, %c0_2] : memref<1x1xf32, #tpu.memory_space<vmem>>, vector<1x1xf32>
    %c0_3 = arith.constant 0 : index
    %c0_4 = arith.constant 0 : index
    %c0_5 = arith.constant 0 : index
    %2 = vector.load %arg1[%c0_3, %c0_4, %c0_5] : memref<2x16x32xf32, #tpu.memory_space<vmem>>, vector<2x16x32xf32>
    %3 = vector.shape_cast %2 : vector<2x16x32xf32> to vector<32x32xf32>
    %cst = arith.constant dense<0.000000e+00> : vector<32x1xf32>
    %4 = tpu.matmul %3, %0, %cst {dimension_numbers = #tpu.dot_dimension_numbers<[1], [0], [0], [1], [0, 0, 1, 1], [], []>} : vector<32x32xf32>, vector<32x1xf32>, vector<32x1xf32> -> vector<32x1xf32>
    %5 = vector.broadcast %1 : vector<1x1xf32> to vector<32x1xf32>
    %6 = arith.addf %4, %5 : vector<32x1xf32>
    %7 = vector.shape_cast %6 : vector<32x1xf32> to vector<2x16x1xf32>
    %c0_6 = arith.constant 0 : index
    %c0_7 = arith.constant 0 : index
    %c0_8 = arith.constant 0 : index
    %8 = vector.load %arg8[%c0_6, %c0_7, %c0_8] : memref<2x16x1xf32, #tpu.memory_space<vmem>>, vector<2x16x1xf32>
    tpu.vector_store %arg8[%c0_6, %c0_7, %c0_8], %7 {strides = array<i32>} : memref<2x16x1xf32, #tpu.memory_space<vmem>>, vector<2x16x1xf32>,
    %9 = tpu.iota {dimensions = array<i32: 1>} : vector<8x16xi32>
    %c0_i32 = arith.constant 0 : i32
    %c2_i32 = arith.constant 2 : i32
    %10 = arith.addi %c0_i32, %c2_i32 : i32
    %c1_i32 = arith.constant 1 : i32
    scf.for %arg10 = %c0_i32 to %10 step %c1_i32  : i32 {
      %20 = arith.index_cast %arg10 : i32 to index
      %c0_21 = arith.constant 0 : index
      %c0_22 = arith.constant 0 : index
      %21 = vector.load %arg1[%20, %c0_21, %c0_22] : memref<2x16x32xf32, #tpu.memory_space<vmem>>, vector<1x16x32xf32>
      %22 = vector.shape_cast %21 : vector<1x16x32xf32> to vector<16x32xf32>
      %23 = arith.index_cast %arg10 : i32 to index
      %c0_23 = arith.constant 0 : index
      %c0_24 = arith.constant 0 : index
      %24 = vector.load %arg8[%23, %c0_23, %c0_24] : memref<2x16x1xf32, #tpu.memory_space<vmem>>, vector<1x16x1xf32>
      %25 = vector.shape_cast %24 : vector<1x16x1xf32> to vector<16x1xf32>
      %26 = vector.shape_cast %25 : vector<16x1xf32> to vector<1x16xf32>
      %27 = vector.shape_cast %26 : vector<1x16xf32> to vector<1x1x16xf32>
      %cst_25 = arith.constant dense<0xFF800000> : vector<1xf32>
      %28 = vector.multi_reduction <maximumf>, %27, %cst_25 [1, 2] : vector<1x1x16xf32> to vector<1xf32>
      %29 = vector.shape_cast %28 : vector<1xf32> to vector<1x1x1xf32>
      %30 = vector.extract %29[0, 0, 0] : f32 from vector<1x1x1xf32>
      %31 = vector.broadcast %30 : f32 to vector<1x16xf32>
      %32 = arith.subf %26, %31 : vector<1x16xf32>
      %33 = math.exp %32 : vector<1x16xf32>
      %34 = arith.index_cast %arg10 : i32 to index
      %c0_26 = arith.constant 0 : index
      %c0_27 = arith.constant 0 : index
      %35 = vector.load %arg2[%34, %c0_26, %c0_27] : memref<2x8x2xi32, #tpu.memory_space<vmem>>, vector<1x8x2xi32>
      %36 = vector.shape_cast %35 : vector<1x8x2xi32> to vector<8x2xi32>
      %37 = vector.extract_strided_slice %36 {offsets = [0, 0], sizes = [8, 1], strides = [1, 1]} : vector<8x2xi32> to vector<8x1xi32>
      %38 = vector.extract_strided_slice %36 {offsets = [0, 1], sizes = [8, 1], strides = [1, 1]} : vector<8x2xi32> to vector<8x1xi32>
      %39 = vector.broadcast %37 : vector<8x1xi32> to vector<8x16xi32>
      %40 = arith.cmpi sge, %9, %39 : vector<8x16xi32>
      %41 = vector.broadcast %38 : vector<8x1xi32> to vector<8x16xi32>
      %42 = arith.cmpi sle, %9, %41 : vector<8x16xi32>
      %43 = arith.andi %40, %42 : vector<8x16xi1>
      %44 = arith.extui %43 : vector<8x16xi1> to vector<8x16xi32>
      %45 = arith.sitofp %44 : vector<8x16xi32> to vector<8x16xf32>
      %46 = vector.broadcast %33 : vector<1x16xf32> to vector<8x16xf32>
      %47 = arith.mulf %45, %46 : vector<8x16xf32>
      %cst_28 = arith.constant dense<0.000000e+00> : vector<8xf32>
      %48 = vector.multi_reduction <add>, %47, %cst_28 [1] : vector<8x16xf32> to vector<8xf32>
      %49 = vector.shape_cast %48 : vector<8xf32> to vector<8x1xf32>
      %cst_29 = arith.constant 9.99999982E-14 : f32
      %50 = vector.broadcast %cst_29 : f32 to vector<8x1xf32>
      %51 = arith.addf %49, %50 : vector<8x1xf32>
      %cst_30 = arith.constant 1.000000e+00 : f32
      %52 = vector.broadcast %cst_30 : f32 to vector<8x1xf32>
      %53 = arith.divf %52, %51 : vector<8x1xf32>
      %cst_31 = arith.constant dense<0.000000e+00> : vector<8x32xf32>
      %54 = tpu.matmul %47, %22, %cst_31 {dimension_numbers = #tpu.dot_dimension_numbers<[1], [0], [0], [1], [0, 0, 1, 1], [], []>} : vector<8x16xf32>, vector<16x32xf32>, vector<8x32xf32> -> vector<8x32xf32>
      %55 = vector.broadcast %53 : vector<8x1xf32> to vector<8x32xf32>
      %56 = arith.mulf %54, %55 : vector<8x32xf32>
      %57 = arith.index_cast %arg10 : i32 to index
      %c0_32 = arith.constant 0 : index
      %c0_33 = arith.constant 0 : index
      %58 = vector.load %arg9[%57, %c0_32, %c0_33] : memref<2x8x32xf32, #tpu.memory_space<vmem>>, vector<1x8x32xf32>
      %59 = vector.shape_cast %58 : vector<1x8x32xf32> to vector<8x32xf32>
      %60 = vector.shape_cast %56 : vector<8x32xf32> to vector<1x8x32xf32>
      tpu.vector_store %arg9[%57, %c0_32, %c0_33], %60 {strides = array<i32>} : memref<2x8x32xf32, #tpu.memory_space<vmem>>, vector<1x8x32xf32>,
    }
    %c2_i32_9 = arith.constant 2 : i32
    %c0_10 = arith.constant 0 : index
    %c0_11 = arith.constant 0 : index
    %11 = vector.load %arg5[%c0_10, %c0_11] : memref<32x128xf32, #tpu.memory_space<vmem>>, vector<32x128xf32>
    %c0_12 = arith.constant 0 : index
    %c0_13 = arith.constant 0 : index
    %12 = vector.load %arg6[%c0_12, %c0_13] : memref<1x128xf32, #tpu.memory_space<vmem>>, vector<1x128xf32>
    %c0_14 = arith.constant 0 : index
    %c0_15 = arith.constant 0 : index
    %c0_16 = arith.constant 0 : index
    %13 = vector.load %arg9[%c0_14, %c0_15, %c0_16] : memref<2x8x32xf32, #tpu.memory_space<vmem>>, vector<2x8x32xf32>
    %14 = vector.shape_cast %13 : vector<2x8x32xf32> to vector<16x32xf32>
    %cst_17 = arith.constant dense<0.000000e+00> : vector<16x128xf32>
    %15 = tpu.matmul %14, %11, %cst_17 {dimension_numbers = #tpu.dot_dimension_numbers<[1], [0], [0], [1], [0, 0, 1, 1], [], []>} : vector<16x32xf32>, vector<32x128xf32>, vector<16x128xf32> -> vector<16x128xf32>
    %16 = vector.broadcast %12 : vector<1x128xf32> to vector<16x128xf32>
    %17 = arith.addf %15, %16 : vector<16x128xf32>
    %18 = vector.shape_cast %17 : vector<16x128xf32> to vector<2x8x128xf32>
    %c0_18 = arith.constant 0 : index
    %c0_19 = arith.constant 0 : index
    %c0_20 = arith.constant 0 : index
    %19 = vector.load %arg7[%c0_18, %c0_19, %c0_20] : memref<2x8x128xf32, #tpu.memory_space<vmem>>, vector<2x8x128xf32>
    tpu.vector_store %arg7[%c0_18, %c0_19, %c0_20], %18 {strides = array<i32>} : memref<2x8x128xf32, #tpu.memory_space<vmem>>, vector<2x8x128xf32>,
    return
  }
  func.func @transform_0(%arg0: i32) -> (i32, i32, i32) {
    %c0_i32 = arith.constant 0 : i32
    %c0_i32_0 = arith.constant 0 : i32
    %c0_i32_1 = arith.constant 0 : i32
    return %arg0, %c0_i32, %c0_i32_0 : i32, i32, i32
  }
  func.func @transform_1(%arg0: i32) -> (i32, i32, i32) {
    %c0_i32 = arith.constant 0 : i32
    %c0_i32_0 = arith.constant 0 : i32
    %c0_i32_1 = arith.constant 0 : i32
    return %arg0, %c0_i32, %c0_i32_0 : i32, i32, i32
  }
  func.func @transform_2(%arg0: i32) -> (i32, i32) {
    %c0_i32 = arith.constant 0 : i32
    %c0_i32_0 = arith.constant 0 : i32
    %c0_i32_1 = arith.constant 0 : i32
    return %c0_i32, %c0_i32_0 : i32, i32
  }
  func.func @transform_3(%arg0: i32) -> (i32, i32) {
    %c0_i32 = arith.constant 0 : i32
    %c0_i32_0 = arith.constant 0 : i32
    %c0_i32_1 = arith.constant 0 : i32
    return %c0_i32, %c0_i32_0 : i32, i32
  }
  func.func @transform_4(%arg0: i32) -> (i32, i32) {
    %c0_i32 = arith.constant 0 : i32
    %c0_i32_0 = arith.constant 0 : i32
    %c0_i32_1 = arith.constant 0 : i32
    return %c0_i32, %c0_i32_0 : i32, i32
  }
  func.func @transform_5(%arg0: i32) -> (i32, i32) {
    %c0_i32 = arith.constant 0 : i32
    %c0_i32_0 = arith.constant 0 : i32
    %c0_i32_1 = arith.constant 0 : i32
    return %c0_i32, %c0_i32_0 : i32, i32
  }
  func.func @transform_6(%arg0: i32) -> (i32, i32, i32) {
    %c0_i32 = arith.constant 0 : i32
    %c0_i32_0 = arith.constant 0 : i32
    %c0_i32_1 = arith.constant 0 : i32
    return %arg0, %c0_i32, %c0_i32_0 : i32, i32, i32
  }
}

</mosaic_0001>

<bundles_post_ra>
// kernel: tpu_custom_call.1
= control target key start
LH: loop header
LB: loop body
LE: loop exit
PB: predicated region body
PF: predicated region fallthrough
CT: control target
= control target key end

     0   :  { %s535_s0 = inlined_call_operand.vmem [shape: f32[2,16,32], index: 0, kind: input, shape index: {}]   ;;  %s536_s1 = inlined_call_operand.vmem [shape: s32[2,8,2], index: 1, kind: input, shape index: {}]   ;;  %s537_s2 = inlined_call_operand.vmem [shape: f32[32,1], index: 2, kind: input, shape index: {}]   ;;  %s538_s3 = inlined_call_operand.<no memory space> [shape: f32[1,1], index: 3, kind: input, shape index: {}]   ;;  %s539_s4 = inlined_call_operand.hbm [shape: f32[32,128], index: 4, kind: input, shape index: {}]   ;;  %s540_s5 = inlined_call_operand.vmem [shape: f32[1,128], index: 5, kind: input, shape index: {}]   ;;  %s541_s6 = inlined_call_operand.hbm [shape: f32[2,8,128], index: 6, kind: output, shape index: {}]  }
   0x1   :  { %v11_v0 = vstv %s538_s3 }
   0x2   :  { %12 = vst [vmem:[#allocation4] sm:$0x1] %v11_v0 }
   0x3   :  { %13 = vsyncpa [#allocation6], 0 }
   0x4   :  { %14 = vsyncpa [#allocation7], 0  ;;  %s27_s25 = sshll.u32 %s539_s4, 4  ;;  %s408_s26 = smov [#allocation5]   ;;  %s28_s25 = int_to_ptr.hbm [resolvable:$true] %s27_s25 }
   0x5   :  { %s29_s27 = sshll.u32 %s408_s26, 4  ;;  %s409_s28 = smov 128   ;;  %s30_s27 = int_to_ptr.vmem [resolvable:$true] %s29_s27 }
   0x6   :  { %s410_s29 = smov 8  }
   0x7   :  { %35 = dma.hbm_to_vmem [thread:$0]  %s28_s25, 512, %s30_s27, [#allocation6], %s409_s28, %s409_s28, %s410_s29  }
   0x8   :  { %400 = dma.done.wait [#allocation6], 512  }
   0x9   :  { %401 = vsyncadd [#allocation6], 4294966784  ;;  %v45_v1 = vld [vmem:[%s537_s2 + $0x18] sm:$0xff]  ;;  %v44_v2 = vld [vmem:[%s537_s2 + $0x10] sm:$0xff]  ;;  %vm54_vm0 = vcmask 261120   ;;  %v101_v9 = vlaneseq  ;;  %vm96_vm1 = vcmask 7168  }
   0xa   :  { %304 = vmatpush.msra.mxu2 %v45_v1  ;;  %305 = vmatpush.msra.mxu3 %v45_v1  ;;  %v43_v3 = vld [vmem:[%s537_s2 + $0x8] sm:$0xff]  ;;  %v42_v4 = vld [vmem:[%s537_s2] sm:$0xff]  ;;  %v49_v5 = vld [vmem:[%s535_s0 + $0x10] sm:$0xff]  ;;  %s493_s19 = smov 0  }
   0xb   :  { %79 = vmatpush.msra.mxu0 %v45_v1  ;;  %303 = vmatpush.msra.mxu1 %v45_v1  ;;  %v50_v6 = vld [vmem:[%s535_s0 + $0x18] sm:$0xff]  ;;  %v47_v7 = vld [vmem:[%s535_s0] sm:$0xff]  ;;  %v48_v8 = vld [vmem:[%s535_s0 + $0x8] sm:$0xff]  ;;  %v487_v10 = vand.u32 127, %v101_v9 }
   0xc   :  { %307 = vmatpush.msra.mxu2 %v44_v2  ;;  %308 = vmatpush.msra.mxu3 %v44_v2  ;;  %v336_v11 = vld [vmem:[#allocation4] ss:$0 sm:$0xff] }
   0xd   :  { %80 = vmatpush.msra.mxu0 %v44_v2  ;;  %306 = vmatpush.msra.mxu1 %v44_v2 }
   0xe   :  { %310 = vmatpush.msra.mxu2 %v43_v3  ;;  %311 = vmatpush.msra.mxu3 %v43_v3 }
   0xf   :  { %81 = vmatpush.msra.mxu0 %v43_v3  ;;  %309 = vmatpush.msra.mxu1 %v43_v3 }
  0x10   :  { %313 = vmatpush.msra.mxu2 %v42_v4  ;;  %314 = vmatpush.msra.mxu3 %v42_v4 }
  0x11   :  { %295 = vmatmul.msk.f32.vlgmr.msra.gmra.mxu2 %vm54_vm0, %v49_v5  ;;  %296 = vmatmul.msk.f32.vlgmr.msra.gmra.mxu3 %vm54_vm0, %v50_v6 }
  0x12   :  { %82 = vmatpush.msra.mxu0 %v42_v4  ;;  %312 = vmatpush.msra.mxu1 %v42_v4 }
  0x13   :  { %293 = vmatmul.msk.f32.vlgmr.msra.gmra.mxu0 %vm54_vm0, %v47_v7  ;;  %294 = vmatmul.msk.f32.vlgmr.msra.gmra.mxu1 %vm54_vm0, %v48_v8 }
  0x90   :  { %v84_v12 = vpop.f32.mrf.mxu0  ;;  %v87_v13 = vpop.f32.mrf.mxu1 }
  0x91   :  { %v85_v14 = vadd.f32 %v336_v11, %v84_v12  ;;  %v88_v15 = vadd.f32 %v336_v11, %v87_v13 }
  0x93   :  { %97 = vst.msk [vmem:[#allocation2] sm:$0xff] %vm96_vm1, %v85_v14 }
  0x94   :  { %98 = vst.msk [vmem:[#allocation2 + $0x8] sm:$0xff] %vm96_vm1, %v88_v15  ;;  %v90_v16 = vpop.f32.mrf.mxu2  ;;  %v93_v17 = vpop.f32.mrf.mxu3 }
  0x95   :  { %v91_v18 = vadd.f32 %v336_v11, %v90_v16  ;;  %v94_v19 = vadd.f32 %v336_v11, %v93_v17 }
  0x97   :  { %99 = vst.msk [vmem:[#allocation2 + $0x10] sm:$0xff] %vm96_vm1, %v91_v18 }
  0x98   :  { %100 = vst.msk [vmem:[#allocation2 + $0x18] sm:$0xff] %vm96_vm1, %v94_v19 }
  0x99 LB: > { %s297_s20 = sshll.u32 %s406_s19, 4  ;;  %s298_s22 = sshll.u32 %s406_s19, 3  ;;  %v411_v31 = vmov 0   ;;  %v412_v33 = vmov 1   ;;  %v156_v46 = vadd.s32 4294967288, %v487_v10  ;;  %vm158_vm5 = vcmask 130112   ;;  %s406_s19 = sphi %s493_s19, %s108_s19  }
  0x9a   : > { %s113_s21 = scalar_lea.vmem [#allocation2], %s297_s20  ;;  %s134_s25 = scalar_lea.vmem %s536_s1, %s298_s22  ;;  %337 = vset.pattern.permute.xlu0 %v411_v31  ;;  %339 = vset.pattern.permute.xlu1 %v411_v31  ;;  %v413_v50 = vmov 0.0   ;;  %vm174_vm6 = vcmask 130048  }
  0x9b   : > { %v135_v32 = vld [vmem:[%s134_s25] sm:$0xff]  ;;  %s110_s30 = scalar_lea.vmem %s535_s0, %s297_s20  ;;  %s218_s7 = scalar_lea.vmem [#allocation3], %s298_s22 }
  0x9c   : > { %137 = vperm.xlu0 %337, %v135_v32   ;;  %v112_v41 = vld [vmem:[%s110_s30 + $0x8] sm:$0xff]  ;;  %v111_v42 = vld [vmem:[%s110_s30] sm:$0xff]  ;;  %s108_s19 = sadd.s32 1, %s406_s19  }
  0x9d   : > { %211 = vmatpush.msra.mxu0 %v112_v41  ;;  %p105_p0 = scmp.ge.s32.totalorder %s108_s19, 2  }
  0x9e   :  { %v223_v5 = vld [vmem:[#allocation5 + $0x18] sm:$0xff] (%p105_p0)  ;;  %v222_v6 = vld [vmem:[#allocation5 + $0x10] sm:$0xff] (%p105_p0)  ;;  %v221_v7 = vld [vmem:[#allocation5 + $0x8] sm:$0xff] (%p105_p0)  ;;  %s414_s0 = smov (%p105_p0), [#allocation8]   ;;  %s267_s11 = sshll.u32 (%p105_p0), %s541_s6, 4  ;;  %s268_s11 = int_to_ptr.hbm [resolvable:$true] %s267_s11 }
  0x9f   : > { %v114_v20 = vld [vmem:[%s113_s21] sm:$0xff]  ;;  %v115_v21 = vld [vmem:[%s113_s21 + $0x8] sm:$0xff]  ;;  %212 = vmatpush.msra.mxu0 %v111_v42  ;;  %315 = vmatpush.msra.mxu1 (%p105_p0), %v223_v5  ;;  %v220_v8 = vld [vmem:[#allocation5] sm:$0xff] (%p105_p0)  ;;  %s265_s1 = sshll.u32 (%p105_p0), %s414_s0, 4  ;;  %s266_s1 = int_to_ptr.vmem [resolvable:$true] %s265_s1 }
  0xa0   : > { %v116_v22 = vsel %vm96_vm1, %v114_v20, -inf  ;;  %v117_v23 = vsel %vm96_vm1, %v115_v21, -inf }
  0xa1   : > { %v118_v24 = vmax.f32 %v116_v22, %v117_v23  ;;  %316 = vmatpush.msra.mxu1 (%p105_p0), %v222_v6 }
  0xa3   : > { %v119_v25 = vrot.slane %v118_v24, 4  ;;  %317 = vmatpush.msra.mxu1 (%p105_p0), %v221_v7 }
  0xa4   : > { %338 = vset.pattern.permute.xlu0 %v412_v33 }
  0xa5   : > { %v120_v26 = vmax.f32 %v118_v24, %v119_v25  ;;  %141 = vperm.xlu0 %338, %v135_v32   ;;  %318 = vmatpush.msra.mxu1 (%p105_p0), %v220_v8 }
  0xa7   : > { %v121_v27 = vrot.slane %v120_v26, 2 }
  0xa9   : > { %v122_v28 = vmax.f32 %v120_v26, %v121_v27 }
  0xab   : > { %v123_v29 = vrot.slane %v122_v28, 1 }
  0xad   : > { %v124_v30 = vmax.f32 %v122_v28, %v123_v29  ;;  %340 = vset.pattern.permute.xlu0 %v411_v31 }
  0xaf   : > { %319 = vpush %v124_v30 }
  0xe0   : > { %s320_s26 = spop %319 }
  0xe1   : > { %v126_v34 = vstv %s320_s26 }
  0xe2   : > { %v127_v35 = vsub.f32 %v114_v20, %v126_v34  ;;  %v128_v37 = vsub.f32 %v115_v21, %v126_v34 }
  0xe4   : > { %v129_v36 = vmul.f32 1.442695, %v127_v35  ;;  %v131_v38 = vmul.f32 1.442695, %v128_v37 }
  0xe6   : > { %341 = vpow2.f32 %v129_v36 }
  0xe7   : > { %343 = vpow2.f32 %v131_v38 }
  0xec   : > { %v342_v39 = vpop.eup %341 }
  0xed   : > { %150 = vperm.xlu1 %339, %v342_v39   ;;  %v344_v40 = vpop.eup %343 }
  0xf5   : > { %153 = vperm.xlu1 %339, %v344_v40  }
 0x10e   : > { %v138_v43 = vpop.permute.xlu0 %137 }
 0x10f   : > { %vm139_vm2 = vcmp.ge.s32.totalorder %v487_v10, %v138_v43 }
 0x117   : > { %v142_v45 = vpop.permute.xlu0 %141 }
 0x118   : > { %vm143_vm3 = vcmp.le.s32.totalorder %v487_v10, %v142_v45 }
 0x119   : > { %vm144_vm4 = vmand %vm139_vm2, %vm143_vm3 }
 0x11a   : > { %v299_v51 = vsel %vm144_vm4, 1.0, %v413_v50 }
 0x15f   : > { %v151_v44 = vpop.permute.xlu1 %150 }
 0x160   : > { %v155_v48 = vperm.slane %v151_v44, %v487_v10  ;;  %v347_v10 = vld [vmem:[%s540_s5] ss:$0 sm:$0xff] (%p105_p0) }
 0x167   : > { %v154_v47 = vpop.permute.xlu1 %153 }
 0x168   : > { %v157_v49 = vperm.slane %v154_v47, %v156_v46 }
 0x16a   : > { %v159_v52 = vsel %vm158_vm5, %v157_v49, %v155_v48 }
 0x16b   : > { %v173_v53 = vmul.f32 %v299_v51, %v159_v52 }
 0x16d   : > { %300 = vmatmul.msk.f32.vlgmr.msra.gmra.mxu0 %vm174_vm6, %v173_v53  ;;  %v175_v54 = vsel %vm174_vm6, %v173_v53, 0.0 }
 0x16e   : > { %176 = vadd.xlane.f32.xlu2 %v175_v54  ;;  %248 = vmatpush.msra.mxu0 (%p105_p0), %v223_v5 }
 0x170   :  { %249 = vmatpush.msra.mxu0 (%p105_p0), %v222_v6 }
 0x172   :  { %250 = vmatpush.msra.mxu0 (%p105_p0), %v221_v7 }
 0x174   :  { %251 = vmatpush.msra.mxu0 (%p105_p0), %v220_v8 }
 0x1e1   : > { %v177_v55 = vpop.xlane.xlu2 %176 }
 0x1e2   : > { %v178_v56 = vadd.f32 1e-13, %v177_v55 }
 0x1e4   : > { %345 = vrcp.f32 %v178_v56  ;;  %v190_v60 = vand.u32 2147483648, %v178_v56  ;;  %v188_v62 = vand.u32 2147483647, %v178_v56  ;;  %vm184_vm8 = vweird.f32 %v178_v56 }
 0x1e6   : > { %v191_v0 = vor.u32 1.1754944e-38, %v190_v60  ;;  %vm189_vm10 = vcmp.eq.f32.partialorder %v188_v62, 8.507059e+37 }
 0x1ea   : > { %v346_v57 = vpop.eup %345  ;;  %v214_v3 = vpop.f32.mrf.mxu0 }
 0x1eb   : > { %v180_v58 = vmul.f32 %v346_v57, %v178_v56  ;;  %vm185_vm7 = vweird.f32 %v346_v57 }
 0x1ec   : > { %vm186_vm9 = vmor %vm184_vm8, %vm185_vm7 }
 0x1ed   : > { %v181_v59 = vsub.f32 1.0, %v180_v58 }
 0x1ef   : > { %v182_v61 = vmul.f32 %v346_v57, %v181_v59 }
 0x1f1   : > { %v183_v63 = vadd.f32 %v346_v57, %v182_v61 }
 0x1f3   : > { %v187_v1 = vsel %vm186_vm9, %v346_v57, %v183_v63  ;;  %107 = sbr.rel (!%p105_p0) target bundleno = 153 (0x99), region = 59 }
 0x1f4   : > { %v192_v2 = vsel %vm189_vm10, %v191_v0, %v187_v1 }
 0x1f5   : > { %v217_v4 = vmul.f32 %v214_v3, %v192_v2 }
 0x1f7   : > { %219 = vst.msk [vmem:[%s218_s7] sm:$0xff] %vm54_vm0, %v217_v4 }
 0x1fe   :  { %v225_v9 = vld [vmem:[#allocation3] sm:$0xff]  ;;  %v226_v11 = vld [vmem:[#allocation3 + $0x8] sm:$0xff] }
 0x1ff   :  { %301 = vmatmul.msk.f32.vlgmr.msra.gmra.mxu0 %vm54_vm0, %v225_v9  ;;  %302 = vmatmul.msk.f32.vlgmr.msra.gmra.mxu1 %vm54_vm0, %v226_v11 }
 0x27c   :  { %v253_v12 = vpop.f32.mrf.mxu0  ;;  %v256_v13 = vpop.f32.mrf.mxu1 }
 0x27d   :  { %v254_v14 = vadd.f32 %v347_v10, %v253_v12  ;;  %v257_v15 = vadd.f32 %v347_v10, %v256_v13 }
 0x27f   :  { %259 = vst [vmem:[#allocation8] sm:$0xff] %v254_v14 }
 0x280   :  { %260 = vst [vmem:[#allocation8 + $0x8] sm:$0xff] %v257_v15 }
 0x281   :  { %273 = dma.vmem_to_hbm [thread:$0]  %s266_s1, 256, %s268_s11, [#allocation7], %s409_s28, %s409_s28, %s410_s29  }
 0x282   :  { %402 = dma.done.wait [#allocation7], 256  }
 0x283   :  { %403 = vsyncadd [#allocation7], 4294967040 }
 0x284   :  { %278 = vsyncpa [#allocation6], 1 }
 0x285   :  { %279 = vsyncpa [#allocation7], 1 }

</bundles_post_ra>
